<compile_context>
chip_gen: v6e
topology: v6e:2x2x1
jax: 0.10.0
libtpu: 0.0.40
codegen_flags: <defaults>
</compile_context>

<pallas_src>
import functools

import jax
import jax.numpy as jnp
from jax import lax
from jax.experimental import pallas as pl
from jax.experimental.pallas import tpu as pltpu


# ---------------------------------------------------------------------------
# Fused kernel: one (batch, row-tile) grid step of the whole bottleneck block
# ---------------------------------------------------------------------------
def _bottleneck_kernel(x_ref, xup_ref, xdn_ref,
                       wfused_ref, b1_ref, w2cat_ref, b2_ref,
                       w3_ref, bsc3_ref,
                       o_ref,
                       z_ref, sc_ref,
                       *, tile_h, width, gw, cout):
    r = pl.program_id(1)
    nr = pl.num_programs(1)
    m = tile_h * width

    # Hoisted weight/bias reads (JAX does not CSE broadcast_in_dim).
    b1 = b1_ref[...]                      # (1, gw)
    b2 = b2_ref[...]                      # (1, gw)
    bsc3 = bsc3_ref[...]                  # (1, cout)  == bs + b3
    wfused = wfused_ref[...]              # (cin, cout + gw) bf16, [shortcut | conv1]

    # --- fused conv1 (1x1) + shortcut (1x1): a single MXU pass over x ------
    xb = x_ref[...].astype(jnp.bfloat16)                          # (m, cin)
    y = jnp.dot(xb, wfused, preferred_element_type=jnp.float32)   # (m, cout+gw)
    sc_ref[...] = y[:, :cout] + bsc3                 # shortcut partial, f32 VMEM
    h1 = jnp.maximum(y[:, cout:] + b1, 0.0)          # (m, gw)
    z_ref[pl.ds(width, m), :] = h1.astype(jnp.bfloat16)

    # --- conv1 on the 1-row halos (zero rows supply the vertical padding) --
    @pl.when(r > 0)
    def _():
        yu = jnp.dot(xup_ref[...].astype(jnp.bfloat16), wfused,
                     preferred_element_type=jnp.float32)
        z_ref[pl.ds(0, width), :] = jnp.maximum(
            yu[:, cout:] + b1, 0.0).astype(jnp.bfloat16)

    @pl.when(r == 0)
    def _():
        z_ref[pl.ds(0, width), :] = jnp.zeros((width, gw), jnp.bfloat16)

    @pl.when(r < nr - 1)
    def _():
        yd = jnp.dot(xdn_ref[...].astype(jnp.bfloat16), wfused,
                     preferred_element_type=jnp.float32)
        z_ref[pl.ds((tile_h + 1) * width, width), :] = jnp.maximum(
            yd[:, cout:] + b1, 0.0).astype(jnp.bfloat16)

    @pl.when(r == nr - 1)
    def _():
        z_ref[pl.ds((tile_h + 1) * width, width), :] = jnp.zeros(
            (width, gw), jnp.bfloat16)

    # --- conv2: 3x3, K concatenated over ky (K = 3*gw), kx via result rolls -
    # Row shift ky is a pure sublane-offset window of the flat h1 scratch; the
    # three windows are lane-concatenated once and reused by all three matmuls.
    lhs = jnp.concatenate(
        [z_ref[pl.ds(0, m), :],
         z_ref[pl.ds(width, m), :],
         z_ref[pl.ds(2 * width, m), :]], axis=-1)                 # (m, 3*gw) bf16

    iota = lax.broadcasted_iota(jnp.int32, (m, gw), 0)
    if (width & (width - 1)) == 0:        # power-of-two fast path
        col = jnp.bitwise_and(iota, width - 1)
    else:
        col = lax.rem(iota, jnp.int32(width))
    first_col = col == 0
    last_col = col == width - 1

    # kx = 1 (center)
    acc = jnp.dot(lhs, w2cat_ref[1], preferred_element_type=jnp.float32)
    # kx = 0 (left neighbour): out[x] += P0[x-1], zero-pad at x == 0
    p0 = jnp.dot(lhs, w2cat_ref[0], preferred_element_type=jnp.float32)
    acc = acc + jnp.where(first_col, 0.0, pltpu.roll(p0, 1, axis=0))
    # kx = 2 (right neighbour): out[x] += P2[x+1], zero-pad at x == W-1
    p2 = jnp.dot(lhs, w2cat_ref[2], preferred_element_type=jnp.float32)
    acc = acc + jnp.where(last_col, 0.0, pltpu.roll(p2, m - 1, axis=0))

    h2 = jnp.maximum(acc + b2, 0.0).astype(jnp.bfloat16)          # (m, gw)

    # --- conv3 (1x1) + residual add + final ReLU ---------------------------
    out = jnp.dot(h2, w3_ref[...], preferred_element_type=jnp.float32)
    o_ref[...] = jnp.maximum(out + sc_ref[...], 0.0).astype(o_ref.dtype)


# ---------------------------------------------------------------------------
# Wrappers
# ---------------------------------------------------------------------------
def _pick_row_tile(h, w, cin, cout, gw, out_itemsize, budget_bytes):
    best = 1
    for cand in range(1, h + 1):
        if h % cand:
            continue
        m = cand * w
        est = (2 * m * cin * 4                 # x tile (double-buffered)
               + 4 * w * cin * 4               # halo rows (double-buffered)
               + 2 * m * cout * out_itemsize   # output tile (double-buffered)
               + (cand + 2) * w * gw * 2       # h1 scratch (bf16)
               + m * cout * 4                  # shortcut scratch (f32)
               + m * 3 * gw * 2                # conv2 LHS staging (bf16)
               + 2 * m * gw * 4)               # conv2 result temporaries (f32)
        if est <= budget_bytes:
            best = cand
    return best


def bottleneck_block_forward_nhwc(x_nhwc, params, *, row_tile=None,
                                  out_dtype=jnp.float32,
                                  vmem_budget_bytes=24 * 1024 * 1024):
    n, h, w, cin = x_nhwc.shape
    gw = params["w1"].shape[1]
    cout = params["w3"].shape[1]
    kp = _pack_params(params)

    out_itemsize = jnp.dtype(out_dtype).itemsize
    if row_tile is None:
        row_tile = _pick_row_tile(h, w, cin, cout, gw, out_itemsize,
                                  vmem_budget_bytes)
    assert h % row_tile == 0, (h, row_tile)
    n_row_tiles = h // row_tile
    m = row_tile * w
    grid = (n, n_row_tiles)

    # Flatten spatial dims: every tile is a whole number of image rows, so the
    # kernel works on natural 2D (pixels, channels) shapes with no reshapes.
    x2 = x_nhwc.reshape(n, h * w, cin)

    def cur_map(b, r):
        return (b, r, 0)

    def up_map(b, r):      # one image row above the tile (clamped at border)
        return (b, jnp.maximum(r * row_tile - 1, 0), 0)

    def dn_map(b, r):      # one image row below the tile (clamped at border)
        return (b, jnp.minimum(r * row_tile + row_tile, h - 1), 0)

    def whole(nd):         # grid-resident weight/bias blocks
        return lambda b, r: (0,) * nd

    in_specs = [
        pl.BlockSpec((None, m, cin), cur_map),        # x (current rows)
        pl.BlockSpec((None, w, cin), up_map),         # x halo row above
        pl.BlockSpec((None, w, cin), dn_map),         # x halo row below
        pl.BlockSpec((cin, cout + gw), whole(2)),     # fused [ws | w1] (BN folded)
        pl.BlockSpec((1, gw), whole(2)),              # b1
        pl.BlockSpec((3, 3 * gw, gw), whole(3)),      # conv2 taps, K-concat over ky
        pl.BlockSpec((1, gw), whole(2)),              # b2
        pl.BlockSpec((gw, cout), whole(2)),           # w3
        pl.BlockSpec((1, cout), whole(2)),            # bs + b3
    ]
    out_specs = pl.BlockSpec((None, m, cout), cur_map)

    npix = n * h * w
    flops = 2 * npix * (cin * (cout + gw) + 9 * gw * gw + gw * cout)
    weight_bytes = sum(int(v.size) * v.dtype.itemsize for v in kp.values())
    bytes_accessed = (npix * cin * 4 + npix * cout * out_itemsize + weight_bytes)

    kernel = functools.partial(_bottleneck_kernel, tile_h=row_tile, width=w,
                               gw=gw, cout=cout)
    y = pl.pallas_call(
        kernel,
        out_shape=jax.ShapeDtypeStruct((n, h * w, cout), out_dtype),
        grid=grid,
        in_specs=in_specs,
        out_specs=out_specs,
        scratch_shapes=[
            pltpu.VMEM(((row_tile + 2) * w, gw), jnp.bfloat16),   # h1 (+ halos)
            pltpu.VMEM((m, cout), jnp.float32),                   # shortcut + bias
        ],
        compiler_params=pltpu.CompilerParams(
            dimension_semantics=("parallel", "parallel"),
            vmem_limit_bytes=48 * 1024 * 1024),
        cost_estimate=pl.CostEstimate(
            flops=int(flops), transcendentals=0,
            bytes_accessed=int(bytes_accessed)),
    )(x2, x2, x2, kp["wfused"], kp["b1"], kp["w2cat"], kp["b2"],
      kp["w3"], kp["bsc3"])
    return y.reshape(n, h, w, cout)


def bottleneck_block_forward(x_nchw, params, *, row_tile=None,
                             out_dtype=jnp.float32):
    # NOTE: in a real model keep activations NHWC (and optionally bf16) end to
    # end; this per-block NCHW<->NHWC round-trip only mirrors PyTorch's API.
    x = jnp.transpose(x_nchw, (0, 2, 3, 1))
    y = bottleneck_block_forward_nhwc(x, params, row_tile=row_tile,
                                      out_dtype=out_dtype)
    return jnp.transpose(y, (0, 3, 1, 2))


# ---------------------------------------------------------------------------
# Parameter construction / packing (BN folded into weights, bf16 weights)
# ---------------------------------------------------------------------------
def _fold_bn(gamma, beta, mean, var, eps=1e-5):
    scale = gamma / jnp.sqrt(var + eps)
    return scale, beta - mean * scale


def make_params(key, in_channels, out_channels, bottleneck_channels,
                num_groups=1, bottleneck_width=64):
    group_width = int(bottleneck_channels * (bottleneck_width / 64.0)) * num_groups
    keys = jax.random.split(key, 24)
    k = iter(keys)

    def bn(c):
        gamma = 0.5 + jax.random.uniform(next(k), (c,), jnp.float32)
        beta = 0.1 * jax.random.normal(next(k), (c,), jnp.float32)
        mean = 0.1 * jax.random.normal(next(k), (c,), jnp.float32)
        var = 0.5 + jax.random.uniform(next(k), (c,), jnp.float32)
        return _fold_bn(gamma, beta, mean, var)

    p = {}
    # conv1: 1x1, in -> group_width, weight laid out (Cin, Cout).
    w1 = 0.1 * jax.random.normal(next(k), (in_channels, group_width), jnp.float32)
    s1, b1 = bn(group_width)
    p["w1"] = (w1 * s1[None, :]).astype(jnp.bfloat16)
    p["b1"] = b1.reshape(1, group_width)

    # conv2: 3x3, group_width -> group_width, HWIO (3, 3, Cin, Cout).
    w2 = 0.1 * jax.random.normal(next(k), (3, 3, group_width, group_width),
                                 jnp.float32)
    s2, b2 = bn(group_width)
    p["w2"] = (w2 * s2[None, None, None, :]).astype(jnp.bfloat16)
    p["b2"] = b2.reshape(1, group_width)

    # conv3: 1x1, group_width -> out.
    w3 = 0.1 * jax.random.normal(next(k), (group_width, out_channels), jnp.float32)
    s3, b3 = bn(out_channels)
    p["w3"] = (w3 * s3[None, :]).astype(jnp.bfloat16)
    p["b3"] = b3.reshape(1, out_channels)

    # shortcut: 1x1, in -> out (present because in_channels != out_channels).
    ws = 0.1 * jax.random.normal(next(k), (in_channels, out_channels), jnp.float32)
    ss, bs = bn(out_channels)
    p["ws"] = (ws * ss[None, :]).astype(jnp.bfloat16)
    p["bs"] = bs.reshape(1, out_channels)
    return p


def _pack_params(p):
    gw = p["w1"].shape[1]
    cout = p["w3"].shape[1]
    # Shortcut columns first so both lane slices of the fused matmul result
    # start at multiples of 128 (Cout is a multiple of 128 in ResNeSt stages).
    wfused = jnp.concatenate([p["ws"], p["w1"]], axis=1)          # (cin, cout+gw)
    # conv2 taps re-packed as (kx, 3*gw, gw): K concatenated over ky.
    w2cat = jnp.transpose(p["w2"], (1, 0, 2, 3)).reshape(3, 3 * gw, gw)
    bsc3 = p["bs"] + p["b3"]
    return {"wfused": wfused, "b1": p["b1"], "w2cat": w2cat,
            "b2": p["b2"], "w3": p["w3"], "bsc3": bsc3}


# ---------------------------------------------------------------------------
# Plain-JAX/XLA reference (same bf16-in / f32-accumulate mixed precision)
# ---------------------------------------------------------------------------
def reference_forward_nhwc(x, p):
    gw = p["w1"].shape[1]
    cout = p["w3"].shape[1]
    xb = x.astype(jnp.bfloat16)
    h1 = jnp.einsum("nhwc,cd->nhwd", xb, p["w1"],
                    preferred_element_type=jnp.float32)
    h1 = jnp.maximum(h1 + p["b1"].reshape(gw), 0.0)
    h2 = lax.conv_general_dilated(
        h1.astype(jnp.bfloat16), p["w2"], window_strides=(1, 1), padding="SAME",
        dimension_numbers=("NHWC", "HWIO", "NHWC"),
        preferred_element_type=jnp.float32)
    h2 = jnp.maximum(h2 + p["b2"].reshape(gw), 0.0)
    main = jnp.einsum("nhwc,cd->nhwd", h2.astype(jnp.bfloat16), p["w3"],
                      preferred_element_type=jnp.float32) + p["b3"].reshape(cout)
    sc = jnp.einsum("nhwc,cd->nhwd", xb, p["ws"],
                    preferred_element_type=jnp.float32) + p["bs"].reshape(cout)
    return jnp.maximum(main + sc, 0.0)


if __name__ == "__main__":
    key = jax.random.PRNGKey(0)
    key_x, key_p = jax.random.split(key)

    # Small shapes: group_width = 32, Cout = 128 (lane-dense output channels).
    N, CIN, H, W = 2, 32, 16, 16
    COUT, CBNECK = 128, 32

    x_nchw = jax.random.normal(key_x, (N, CIN, H, W), jnp.float32)  # NCHW like PyTorch
    params = make_params(key_p, CIN, COUT, CBNECK)

    # row_tile=4 -> 4 row tiles per image, exercising top/bottom borders and
    # fully-interior tiles of the 3x3 halo logic.
    out_nchw = bottleneck_block_forward(x_nchw, params, row_tile=4)
    out_nchw = jax.block_until_ready(out_nchw)

    assert out_nchw.shape == (N, COUT, H, W), out_nchw.shape
    assert bool(jnp.all(out_nchw >= 0.0)), "final ReLU violated"

    # Cross-check against the XLA reference.
    x_nhwc = jnp.transpose(x_nchw, (0, 2, 3, 1))
    ref_nchw = jnp.transpose(reference_forward_nhwc(x_nhwc, params), (0, 3, 1, 2))
    if not bool(jnp.allclose(out_nchw, ref_nchw, rtol=2e-2, atol=2e-2)):
        max_err = float(jnp.max(jnp.abs(out_nchw - ref_nchw)))
        raise AssertionError(f"mismatch vs reference, max abs err = {max_err}")

    print("KERNEL_OK")
</pallas_src>

<mosaic_0001>
module attributes {stable_mosaic.version = 11 : i64} {
  func.func @_bottleneck_kernel(%arg0: i32, %arg1: i32, %arg2: memref<1x64x32xf32, #tpu.memory_space<vmem>>, %arg3: memref<1x16x32xf32, #tpu.memory_space<vmem>>, %arg4: memref<1x16x32xf32, #tpu.memory_space<vmem>>, %arg5: memref<32x160xbf16, #tpu.memory_space<vmem>>, %arg6: memref<1x32xf32, #tpu.memory_space<vmem>>, %arg7: memref<3x96x32xbf16, #tpu.memory_space<vmem>>, %arg8: memref<1x32xf32, #tpu.memory_space<vmem>>, %arg9: memref<32x128xbf16, #tpu.memory_space<vmem>>, %arg10: memref<1x128xf32, #tpu.memory_space<vmem>>, %arg11: memref<1x64x128xf32, #tpu.memory_space<vmem>>, %arg12: memref<96x32xbf16, #tpu.memory_space<vmem>>, %arg13: memref<64x128xf32, #tpu.memory_space<vmem>>) attributes {dimension_semantics = [#tpu.dimension_semantics<parallel>, #tpu.dimension_semantics<parallel>], iteration_bounds = array<i64: 2, 4>, scalar_prefetch = 0 : i64, scratch_operands = 2 : i64, tpu.core_type = #tpu.core_type<tc>, window_params = [{transform_indices = @transform_0, window_bounds = array<i64: 1, 64, 32>}, {transform_indices = @transform_1, window_bounds = array<i64: 1, 16, 32>}, {transform_indices = @transform_2, window_bounds = array<i64: 1, 16, 32>}, {pipeline_mode = #tpu.pipeline_mode<synchronous>, transform_indices = @transform_3, window_bounds = array<i64: 32, 160>}, {pipeline_mode = #tpu.pipeline_mode<synchronous>, transform_indices = @transform_4, window_bounds = array<i64: 1, 32>}, {pipeline_mode = #tpu.pipeline_mode<synchronous>, transform_indices = @transform_5, window_bounds = array<i64: 3, 96, 32>}, {pipeline_mode = #tpu.pipeline_mode<synchronous>, transform_indices = @transform_6, window_bounds = array<i64: 1, 32>}, {pipeline_mode = #tpu.pipeline_mode<synchronous>, transform_indices = @transform_7, window_bounds = array<i64: 32, 128>}, {pipeline_mode = #tpu.pipeline_mode<synchronous>, transform_indices = @transform_8, window_bounds = array<i64: 1, 128>}, {transform_indices = @transform_9, window_bounds = array<i64: 1, 64, 128>}]} {
    %c0 = arith.constant 0 : index
    %c0_0 = arith.constant 0 : index
    %0 = vector.load %arg6[%c0, %c0_0] : memref<1x32xf32, #tpu.memory_space<vmem>>, vector<1x32xf32>
    %c0_1 = arith.constant 0 : index
    %c0_2 = arith.constant 0 : index
    %1 = vector.load %arg8[%c0_1, %c0_2] : memref<1x32xf32, #tpu.memory_space<vmem>>, vector<1x32xf32>
    %c0_3 = arith.constant 0 : index
    %c0_4 = arith.constant 0 : index
    %2 = vector.load %arg10[%c0_3, %c0_4] : memref<1x128xf32, #tpu.memory_space<vmem>>, vector<1x128xf32>
    %c0_5 = arith.constant 0 : index
    %c0_6 = arith.constant 0 : index
    %3 = vector.load %arg5[%c0_5, %c0_6] : memref<32x160xbf16, #tpu.memory_space<vmem>>, vector<32x160xbf16>
    %c0_7 = arith.constant 0 : index
    %c0_8 = arith.constant 0 : index
    %c0_9 = arith.constant 0 : index
    %4 = vector.load %arg2[%c0_7, %c0_8, %c0_9] : memref<1x64x32xf32, #tpu.memory_space<vmem>>, vector<1x64x32xf32>
    %5 = vector.shape_cast %4 : vector<1x64x32xf32> to vector<64x32xf32>
    %6 = arith.truncf %5 : vector<64x32xf32> to vector<64x32xbf16>
    %cst = arith.constant dense<0.000000e+00> : vector<64x160xf32>
    %7 = tpu.matmul %6, %3, %cst {dimension_numbers = #tpu.dot_dimension_numbers<[1], [0], [0], [1], [0, 0, 1, 1], [], []>} : vector<64x32xbf16>, vector<32x160xbf16>, vector<64x160xf32> -> vector<64x160xf32>
    %8 = vector.extract_strided_slice %7 {offsets = [0, 0], sizes = [64, 128], strides = [1, 1]} : vector<64x160xf32> to vector<64x128xf32>
    %9 = vector.broadcast %2 : vector<1x128xf32> to vector<64x128xf32>
    %10 = arith.addf %8, %9 : vector<64x128xf32>
    %c0_10 = arith.constant 0 : index
    %c0_11 = arith.constant 0 : index
    %11 = vector.load %arg13[%c0_10, %c0_11] : memref<64x128xf32, #tpu.memory_space<vmem>>, vector<64x128xf32>
    tpu.vector_store %arg13[%c0_10, %c0_11], %10 {strides = array<i32>} : memref<64x128xf32, #tpu.memory_space<vmem>>, vector<64x128xf32>,
    %12 = vector.extract_strided_slice %7 {offsets = [0, 128], sizes = [64, 32], strides = [1, 1]} : vector<64x160xf32> to vector<64x32xf32>
    %13 = vector.broadcast %0 : vector<1x32xf32> to vector<64x32xf32>
    %14 = arith.addf %12, %13 : vector<64x32xf32>
    %cst_12 = arith.constant 0.000000e+00 : f32
    %15 = vector.broadcast %cst_12 : f32 to vector<64x32xf32>
    %16 = arith.maximumf %14, %15 : vector<64x32xf32>
    %17 = arith.truncf %16 : vector<64x32xf32> to vector<64x32xbf16>
    %c16 = arith.constant 16 : index
    %c0_13 = arith.constant 0 : index
    %18 = vector.load %arg12[%c16, %c0_13] : memref<96x32xbf16, #tpu.memory_space<vmem>>, vector<64x32xbf16>
    tpu.vector_store %arg12[%c16, %c0_13], %17 {strides = array<i32>} : memref<96x32xbf16, #tpu.memory_space<vmem>>, vector<64x32xbf16>,
    %c0_i32 = arith.constant 0 : i32
    %19 = arith.cmpi sgt, %arg1, %c0_i32 : i32
    %20 = arith.extui %19 : i1 to i32
    %c0_i32_14 = arith.constant 0 : i32
    %21 = arith.cmpi ne, %20, %c0_i32_14 : i32
    scf.if %21 {
      %c0_49 = arith.constant 0 : index
      %c0_50 = arith.constant 0 : index
      %c0_51 = arith.constant 0 : index
      %73 = vector.load %arg3[%c0_49, %c0_50, %c0_51] : memref<1x16x32xf32, #tpu.memory_space<vmem>>, vector<1x16x32xf32>
      %74 = vector.shape_cast %73 : vector<1x16x32xf32> to vector<16x32xf32>
      %75 = arith.truncf %74 : vector<16x32xf32> to vector<16x32xbf16>
      %cst_52 = arith.constant dense<0.000000e+00> : vector<16x160xf32>
      %76 = tpu.matmul %75, %3, %cst_52 {dimension_numbers = #tpu.dot_dimension_numbers<[1], [0], [0], [1], [0, 0, 1, 1], [], []>} : vector<16x32xbf16>, vector<32x160xbf16>, vector<16x160xf32> -> vector<16x160xf32>
      %77 = vector.extract_strided_slice %76 {offsets = [0, 128], sizes = [16, 32], strides = [1, 1]} : vector<16x160xf32> to vector<16x32xf32>
      %78 = vector.broadcast %0 : vector<1x32xf32> to vector<16x32xf32>
      %79 = arith.addf %77, %78 : vector<16x32xf32>
      %cst_53 = arith.constant 0.000000e+00 : f32
      %80 = vector.broadcast %cst_53 : f32 to vector<16x32xf32>
      %81 = arith.maximumf %79, %80 : vector<16x32xf32>
      %82 = arith.truncf %81 : vector<16x32xf32> to vector<16x32xbf16>
      %c0_54 = arith.constant 0 : index
      %c0_55 = arith.constant 0 : index
      %83 = vector.load %arg12[%c0_54, %c0_55] : memref<96x32xbf16, #tpu.memory_space<vmem>>, vector<16x32xbf16>
      tpu.vector_store %arg12[%c0_54, %c0_55], %82 {strides = array<i32>} : memref<96x32xbf16, #tpu.memory_space<vmem>>, vector<16x32xbf16>,
    } else {
    }
    %c0_i32_15 = arith.constant 0 : i32
    %22 = arith.cmpi eq, %arg1, %c0_i32_15 : i32
    %23 = arith.extui %22 : i1 to i32
    %c0_i32_16 = arith.constant 0 : i32
    %24 = arith.cmpi ne, %23, %c0_i32_16 : i32
    scf.if %24 {
      %cst_49 = arith.constant 0.000000e+00 : bf16
      %73 = vector.broadcast %cst_49 : bf16 to vector<16x32xbf16>
      %c0_50 = arith.constant 0 : index
      %c0_51 = arith.constant 0 : index
      %74 = vector.load %arg12[%c0_50, %c0_51] : memref<96x32xbf16, #tpu.memory_space<vmem>>, vector<16x32xbf16>
      tpu.vector_store %arg12[%c0_50, %c0_51], %73 {strides = array<i32>} : memref<96x32xbf16, #tpu.memory_space<vmem>>, vector<16x32xbf16>,
    } else {
    }
    %c3_i32 = arith.constant 3 : i32
    %25 = arith.cmpi slt, %arg1, %c3_i32 : i32
    %26 = arith.extui %25 : i1 to i32
    %c0_i32_17 = arith.constant 0 : i32
    %27 = arith.cmpi ne, %26, %c0_i32_17 : i32
    scf.if %27 {
      %c0_49 = arith.constant 0 : index
      %c0_50 = arith.constant 0 : index
      %c0_51 = arith.constant 0 : index
      %73 = vector.load %arg4[%c0_49, %c0_50, %c0_51] : memref<1x16x32xf32, #tpu.memory_space<vmem>>, vector<1x16x32xf32>
      %74 = vector.shape_cast %73 : vector<1x16x32xf32> to vector<16x32xf32>
      %75 = arith.truncf %74 : vector<16x32xf32> to vector<16x32xbf16>
      %cst_52 = arith.constant dense<0.000000e+00> : vector<16x160xf32>
      %76 = tpu.matmul %75, %3, %cst_52 {dimension_numbers = #tpu.dot_dimension_numbers<[1], [0], [0], [1], [0, 0, 1, 1], [], []>} : vector<16x32xbf16>, vector<32x160xbf16>, vector<16x160xf32> -> vector<16x160xf32>
      %77 = vector.extract_strided_slice %76 {offsets = [0, 128], sizes = [16, 32], strides = [1, 1]} : vector<16x160xf32> to vector<16x32xf32>
      %78 = vector.broadcast %0 : vector<1x32xf32> to vector<16x32xf32>
      %79 = arith.addf %77, %78 : vector<16x32xf32>
      %cst_53 = arith.constant 0.000000e+00 : f32
      %80 = vector.broadcast %cst_53 : f32 to vector<16x32xf32>
      %81 = arith.maximumf %79, %80 : vector<16x32xf32>
      %82 = arith.truncf %81 : vector<16x32xf32> to vector<16x32xbf16>
      %c80 = arith.constant 80 : index
      %c0_54 = arith.constant 0 : index
      %83 = vector.load %arg12[%c80, %c0_54] : memref<96x32xbf16, #tpu.memory_space<vmem>>, vector<16x32xbf16>
      tpu.vector_store %arg12[%c80, %c0_54], %82 {strides = array<i32>} : memref<96x32xbf16, #tpu.memory_space<vmem>>, vector<16x32xbf16>,
    } else {
    }
    %c3_i32_18 = arith.constant 3 : i32
    %28 = arith.cmpi eq, %arg1, %c3_i32_18 : i32
    %29 = arith.extui %28 : i1 to i32
    %c0_i32_19 = arith.constant 0 : i32
    %30 = arith.cmpi ne, %29, %c0_i32_19 : i32
    scf.if %30 {
      %cst_49 = arith.constant 0.000000e+00 : bf16
      %73 = vector.broadcast %cst_49 : bf16 to vector<16x32xbf16>
      %c80 = arith.constant 80 : index
      %c0_50 = arith.constant 0 : index
      %74 = vector.load %arg12[%c80, %c0_50] : memref<96x32xbf16, #tpu.memory_space<vmem>>, vector<16x32xbf16>
      tpu.vector_store %arg12[%c80, %c0_50], %73 {strides = array<i32>} : memref<96x32xbf16, #tpu.memory_space<vmem>>, vector<16x32xbf16>,
    } else {
    }
    %c0_20 = arith.constant 0 : index
    %c0_21 = arith.constant 0 : index
    %31 = vector.load %arg12[%c0_20, %c0_21] : memref<96x32xbf16, #tpu.memory_space<vmem>>, vector<64x32xbf16>
    %c16_22 = arith.constant 16 : index
    %c0_23 = arith.constant 0 : index
    %32 = vector.load %arg12[%c16_22, %c0_23] : memref<96x32xbf16, #tpu.memory_space<vmem>>, vector<64x32xbf16>
    %c32 = arith.constant 32 : index
    %c0_24 = arith.constant 0 : index
    %33 = vector.load %arg12[%c32, %c0_24] : memref<96x32xbf16, #tpu.memory_space<vmem>>, vector<64x32xbf16>
    %34 = tpu.concatenate %31, %32, %33 in 1 : vector<64x32xbf16>, vector<64x32xbf16>, vector<64x32xbf16> -> vector<64x96xbf16>
    %35 = tpu.iota {dimensions = array<i32: 0>} : vector<64x32xi32>
    %c15_i32 = arith.constant 15 : i32
    %36 = vector.broadcast %c15_i32 : i32 to vector<64x32xi32>
    %37 = arith.andi %35, %36 : vector<64x32xi32>
    %c0_i32_25 = arith.constant 0 : i32
    %38 = vector.broadcast %c0_i32_25 : i32 to vector<64x32xi32>
    %39 = arith.cmpi eq, %37, %38 : vector<64x32xi32>
    %c15_i32_26 = arith.constant 15 : i32
    %40 = vector.broadcast %c15_i32_26 : i32 to vector<64x32xi32>
    %41 = arith.cmpi eq, %37, %40 : vector<64x32xi32>
    %c1 = arith.constant 1 : index
    %c0_27 = arith.constant 0 : index
    %c0_28 = arith.constant 0 : index
    %42 = vector.load %arg7[%c1, %c0_27, %c0_28] : memref<3x96x32xbf16, #tpu.memory_space<vmem>>, vector<1x96x32xbf16>
    %43 = vector.shape_cast %42 : vector<1x96x32xbf16> to vector<96x32xbf16>
    %cst_29 = arith.constant dense<0.000000e+00> : vector<64x32xf32>
    %44 = tpu.matmul %34, %43, %cst_29 {dimension_numbers = #tpu.dot_dimension_numbers<[1], [0], [0], [1], [0, 0, 1, 1], [], []>} : vector<64x96xbf16>, vector<96x32xbf16>, vector<64x32xf32> -> vector<64x32xf32>
    %c0_30 = arith.constant 0 : index
    %c0_31 = arith.constant 0 : index
    %c0_32 = arith.constant 0 : index
    %45 = vector.load %arg7[%c0_30, %c0_31, %c0_32] : memref<3x96x32xbf16, #tpu.memory_space<vmem>>, vector<1x96x32xbf16>
    %46 = vector.shape_cast %45 : vector<1x96x32xbf16> to vector<96x32xbf16>
    %cst_33 = arith.constant dense<0.000000e+00> : vector<64x32xf32>
    %47 = tpu.matmul %34, %46, %cst_33 {dimension_numbers = #tpu.dot_dimension_numbers<[1], [0], [0], [1], [0, 0, 1, 1], [], []>} : vector<64x96xbf16>, vector<96x32xbf16>, vector<64x32xf32> -> vector<64x32xf32>
    %c1_i32 = arith.constant 1 : i32
    %48 = tpu.dynamic_rotate %47 by %c1_i32 dim 0 : vector<64x32xf32>, i32 -> vector<64x32xf32>
    %cst_34 = arith.constant 0.000000e+00 : f32
    %49 = vector.broadcast %cst_34 : f32 to vector<64x32xf32>
    %50 = arith.select %39, %49, %48 : vector<64x32xi1>, vector<64x32xf32>
    %51 = arith.addf %44, %50 : vector<64x32xf32>
    %c2 = arith.constant 2 : index
    %c0_35 = arith.constant 0 : index
    %c0_36 = arith.constant 0 : index
    %52 = vector.load %arg7[%c2, %c0_35, %c0_36] : memref<3x96x32xbf16, #tpu.memory_space<vmem>>, vector<1x96x32xbf16>
    %53 = vector.shape_cast %52 : vector<1x96x32xbf16> to vector<96x32xbf16>
    %cst_37 = arith.constant dense<0.000000e+00> : vector<64x32xf32>
    %54 = tpu.matmul %34, %53, %cst_37 {dimension_numbers = #tpu.dot_dimension_numbers<[1], [0], [0], [1], [0, 0, 1, 1], [], []>} : vector<64x96xbf16>, vector<96x32xbf16>, vector<64x32xf32> -> vector<64x32xf32>
    %c63_i32 = arith.constant 63 : i32
    %55 = tpu.dynamic_rotate %54 by %c63_i32 dim 0 : vector<64x32xf32>, i32 -> vector<64x32xf32>
    %cst_38 = arith.constant 0.000000e+00 : f32
    %56 = vector.broadcast %cst_38 : f32 to vector<64x32xf32>
    %57 = arith.select %41, %56, %55 : vector<64x32xi1>, vector<64x32xf32>
    %58 = arith.addf %51, %57 : vector<64x32xf32>
    %59 = vector.broadcast %1 : vector<1x32xf32> to vector<64x32xf32>
    %60 = arith.addf %58, %59 : vector<64x32xf32>
    %cst_39 = arith.constant 0.000000e+00 : f32
    %61 = vector.broadcast %cst_39 : f32 to vector<64x32xf32>
    %62 = arith.maximumf %60, %61 : vector<64x32xf32>
    %63 = arith.truncf %62 : vector<64x32xf32> to vector<64x32xbf16>
    %c0_40 = arith.constant 0 : index
    %c0_41 = arith.constant 0 : index
    %64 = vector.load %arg9[%c0_40, %c0_41] : memref<32x128xbf16, #tpu.memory_space<vmem>>, vector<32x128xbf16>
    %cst_42 = arith.constant dense<0.000000e+00> : vector<64x128xf32>
    %65 = tpu.matmul %63, %64, %cst_42 {dimension_numbers = #tpu.dot_dimension_numbers<[1], [0], [0], [1], [0, 0, 1, 1], [], []>} : vector<64x32xbf16>, vector<32x128xbf16>, vector<64x128xf32> -> vector<64x128xf32>
    %c0_43 = arith.constant 0 : index
    %c0_44 = arith.constant 0 : index
    %66 = vector.load %arg13[%c0_43, %c0_44] : memref<64x128xf32, #tpu.memory_space<vmem>>, vector<64x128xf32>
    %67 = arith.addf %65, %66 : vector<64x128xf32>
    %cst_45 = arith.constant 0.000000e+00 : f32
    %68 = vector.broadcast %cst_45 : f32 to vector<64x128xf32>
    %69 = arith.maximumf %67, %68 : vector<64x128xf32>
    %c0_46 = arith.constant 0 : index
    %c0_47 = arith.constant 0 : index
    %c0_48 = arith.constant 0 : index
    %70 = vector.load %arg11[%c0_46, %c0_47, %c0_48] : memref<1x64x128xf32, #tpu.memory_space<vmem>>, vector<1x64x128xf32>
    %71 = vector.shape_cast %70 : vector<1x64x128xf32> to vector<64x128xf32>
    %72 = vector.shape_cast %69 : vector<64x128xf32> to vector<1x64x128xf32>
    tpu.vector_store %arg11[%c0_46, %c0_47, %c0_48], %72 {strides = array<i32>} : memref<1x64x128xf32, #tpu.memory_space<vmem>>, vector<1x64x128xf32>,
    return
  }
  func.func @transform_0(%arg0: i32, %arg1: i32) -> (i32, i32, i32) {
    %c0_i32 = arith.constant 0 : i32
    %c0_i32_0 = arith.constant 0 : i32
    return %arg0, %arg1, %c0_i32 : i32, i32, i32
  }
  func.func @transform_1(%arg0: i32, %arg1: i32) -> (i32, i32, i32) {
    %c4_i32 = arith.constant 4 : i32
    %0 = arith.muli %arg1, %c4_i32 : i32
    %c1_i32 = arith.constant 1 : i32
    %1 = arith.subi %0, %c1_i32 : i32
    %c0_i32 = arith.constant 0 : i32
    %2 = arith.maxsi %1, %c0_i32 : i32
    %c0_i32_0 = arith.constant 0 : i32
    %c0_i32_1 = arith.constant 0 : i32
    return %arg0, %2, %c0_i32_0 : i32, i32, i32
  }
  func.func @transform_2(%arg0: i32, %arg1: i32) -> (i32, i32, i32) {
    %c4_i32 = arith.constant 4 : i32
    %0 = arith.muli %arg1, %c4_i32 : i32
    %c4_i32_0 = arith.constant 4 : i32
    %1 = arith.addi %0, %c4_i32_0 : i32
    %c15_i32 = arith.constant 15 : i32
    %2 = arith.minsi %1, %c15_i32 : i32
    %c0_i32 = arith.constant 0 : i32
    %c0_i32_1 = arith.constant 0 : i32
    return %arg0, %2, %c0_i32 : i32, i32, i32
  }
  func.func @transform_3(%arg0: i32, %arg1: i32) -> (i32, i32) {
    %c0_i32 = arith.constant 0 : i32
    %c0_i32_0 = arith.constant 0 : i32
    %c0_i32_1 = arith.constant 0 : i32
    return %c0_i32, %c0_i32_0 : i32, i32
  }
  func.func @transform_4(%arg0: i32, %arg1: i32) -> (i32, i32) {
    %c0_i32 = arith.constant 0 : i32
    %c0_i32_0 = arith.constant 0 : i32
    %c0_i32_1 = arith.constant 0 : i32
    return %c0_i32, %c0_i32_0 : i32, i32
  }
  func.func @transform_5(%arg0: i32, %arg1: i32) -> (i32, i32, i32) {
    %c0_i32 = arith.constant 0 : i32
    %c0_i32_0 = arith.constant 0 : i32
    %c0_i32_1 = arith.constant 0 : i32
    %c0_i32_2 = arith.constant 0 : i32
    return %c0_i32, %c0_i32_0, %c0_i32_1 : i32, i32, i32
  }
  func.func @transform_6(%arg0: i32, %arg1: i32) -> (i32, i32) {
    %c0_i32 = arith.constant 0 : i32
    %c0_i32_0 = arith.constant 0 : i32
    %c0_i32_1 = arith.constant 0 : i32
    return %c0_i32, %c0_i32_0 : i32, i32
  }
  func.func @transform_7(%arg0: i32, %arg1: i32) -> (i32, i32) {
    %c0_i32 = arith.constant 0 : i32
    %c0_i32_0 = arith.constant 0 : i32
    %c0_i32_1 = arith.constant 0 : i32
    return %c0_i32, %c0_i32_0 : i32, i32
  }
  func.func @transform_8(%arg0: i32, %arg1: i32) -> (i32, i32) {
    %c0_i32 = arith.constant 0 : i32
    %c0_i32_0 = arith.constant 0 : i32
    %c0_i32_1 = arith.constant 0 : i32
    return %c0_i32, %c0_i32_0 : i32, i32
  }
  func.func @transform_9(%arg0: i32, %arg1: i32) -> (i32, i32, i32) {
    %c0_i32 = arith.constant 0 : i32
    %c0_i32_0 = arith.constant 0 : i32
    return %arg0, %arg1, %c0_i32 : i32, i32, i32
  }
}

</mosaic_0001>

<bundles_post_ra>
// kernel: tpu_custom_call.1
= control target key start
LH: loop header
LB: loop body
LE: loop exit
PB: predicated region body
PF: predicated region fallthrough
CT: control target
= control target key end

     0   :  { %s2635_s0 = inlined_call_operand.vmem [shape: f32[2,256,32], index: 0, kind: input, shape index: {}]   ;;  %s2636_s1 = inlined_call_operand.vmem [shape: f32[2,256,32], index: 1, kind: input, shape index: {}]   ;;  %s2637_s2 = inlined_call_operand.vmem [shape: f32[2,256,32], index: 2, kind: input, shape index: {}]   ;;  %s2638_s3 = inlined_call_operand.vmem [shape: bf16[32,160], index: 3, kind: input, shape index: {}]   ;;  %s2639_s4 = inlined_call_operand.vmem [shape: f32[1,32], index: 4, kind: input, shape index: {}]   ;;  %s2640_s5 = inlined_call_operand.vmem [shape: bf16[3,96,32], index: 5, kind: input, shape index: {}]   ;;  %s2641_s6 = inlined_call_operand.vmem [shape: f32[1,32], index: 6, kind: input, shape index: {}]   ;;  %s2642_s7 = inlined_call_operand.vmem [shape: bf16[32,128], index: 7, kind: input, shape index: {}]   ;;  %s2643_s8 = inlined_call_operand.vmem [shape: f32[1,128], index: 8, kind: input, shape index: {}]   ;;  %s2644_s9 = inlined_call_operand.hbm [shape: f32[2,256,128], index: 9, kind: output, shape index: {}]  }
   0x1   :  { %2650 = sst [smem:[#allocation12_spill]] %s2635_s0 }
   0x2   :  { %2651 = sst [smem:[#allocation13_spill]] %s2638_s3 }
   0x3   :  { %2652 = sst [smem:[#allocation14_spill]] %s2641_s6 }
   0x4   :  { %14 = vsyncpa [#allocation5], 0 }
   0x5   :  { %16 = vsyncpa [#allocation5 + $0x1], 0  ;;  %s2155_s30 = smov 0   ;;  %s2157_s10 = smov 0  }
   0x6   :  { %s2159_s11 = smov 0   ;;  %s2161_s12 = smov 0  }
   0x7   :  { %s2163_s13 = smov 0   ;;  %s2165_s14 = smov 0  }
   0x8   :  { %s2167_s15 = smov 0   ;;  %s2169_s16 = smov 0  }
   0x9 LB: > { %2653 = sst [smem:[#allocation7_spill]] %s2085_s14  ;;  %s1640_s17 = sadd.s32 4294967295, %s2093_s16   ;;  %s2093_s16 = sphi %s2169_s16, %s22_s16   ;;  %s2089_s15 = sphi %s2167_s15, %s2684_s15   ;;  %s2085_s14 = sphi %s2165_s14, %s2683_s14   ;;  %s2081_s13 = sphi %s2163_s13, %s2682_s13   ;;  %s2077_s12 = sphi %s2161_s12, %s2681_s12   ;;  %s2073_s11 = sphi %s2159_s11, %s2687_s11   ;;  %s2069_s10 = sphi %s2157_s10, %s2686_s10   ;;  %s2065_s30 = sphi %s2155_s30, %s2685_s30  }
   0xa   : > { %2654 = sst [smem:[#allocation8_spill]] %s2089_s15  ;;  %s1641_s18 = sadd.s32 4294967294, %s2093_s16  }
   0xb   : > { %s31_s19 = sadd.s32 1, %s2085_s14  ;;  %s34_s20 = sadd.s32 1, %s2089_s15 }
   0xc   : > { %p32_p0 = scmp.ge.s32.totalorder %s31_s19, 4  ;;  %p279_p1 = scmp.ne.s32.totalorder %s2073_s11, %s2069_s10 }
   0xd   : > { %p280_p2 = scmp.eq.s32.totalorder %s1640_s17, 7  ;;  %p285_p5 = scmp.ne.s32.totalorder %s2069_s10, %s2065_s30 }
   0xe   : > { %s2689_s19 = smov (%p32_p0, %s31_s19), 0  ;;  %s2691_s20 = smov (!%p32_p0, %s34_s20), %s2089_s15 }
   0xf   : > { %2655 = sst [smem:[#allocation9_spill]] %s2689_s19  ;;  %s265_s21 = ssub.s32 %s2085_s14, %s2689_s19 }
  0x10   : > { %p2206_p3 = por %p280_p2, %p279_p1  ;;  %p36_p4 = scmp.ge.s32.totalorder %s2691_s20, 2 }
  0x11   : > { %p286_p6 = scmp.eq.s32.totalorder %s1641_s18, 7  ;;  %p1650_p7 = scmp.ge.s32.totalorder %s2093_s16, 1 }
  0x12   : > { %s2693_s20 = smov (%p36_p4, %s2691_s20), 0  ;;  %p377_p9 = scmp.lt.s32.totalorder %s2093_s16, 9 }
  0x13   : > { %2657 = sst [smem:[#allocation10_spill]] %s2693_s20  ;;  %p2215_p8 = por %p286_p6, %p285_p5 }
  0x14   : > { %s264_s24 = ssub.s32 %s2089_s15, %s2693_s20  ;;  %s269_s25 = sadd.s32 1, %s2073_s11 }
  0x15   : > { %s266_s26 = sor.u32 %s265_s21, %s264_s24  ;;  %p378_p10 = pnand %p1650_p7, %p377_p9 }
  0x16   : > { %p267_p11 = scmp.eq.s32.totalorder %s266_s26, 0  ;;  %s2645_s28 = sand.u32 (!%p378_p10), 1, %s2069_s10  }
  0x17   : > { %381 = sbr.rel (%p378_p10) target bundleno = 1294 (0x50e), region = 56  ;;  %s2660_s6 = sld [smem:[#allocation14_spill]] (!%p378_p10) }
  0x18   : > { %s2224_s27 = scalar_select %p267_p11, %s2073_s11, %s269_s25  }
  0x19   : > { %s2234_s18 = sshll.u32 (!%p378_p10), %s2645_s28, 6  ;;  %s2661_s3 = sld [smem:[#allocation13_spill]] (!%p378_p10) }
  0x1a   : > { %2659 = sst [smem:[#allocation11_spill]] %s2224_s27  ;;  %s2254_s21 = sshll.u32 (!%p378_p10), %s2077_s12, 3 }
  0x1b   : > { %p444_p12 = scmp.lt.s32.totalorder (!%p378_p10), %s2081_s13, 1  ;;  %p446_p13 = scmp.lt.s32.totalorder (!%p378_p10), %s2254_s21, 31 }
  0x1c   : > { %v2095_v3 = vmov 0   ;;  %s1655_s26 = sshll.u32 %s2077_s12, 2  ;;  %s2662_s0 = sld [smem:[#allocation12_spill]]  ;;  %vm530_vm0 = vcmask 261120   ;;  %v1672_v18 = vld [vmem:[%s2643_s8] ss:$0 sm:$0xff] }
  0x1d   : > { %v2230_v0 = vld [vmem:[%s2660_s6] ss:$0 sm:$0xff]  ;;  %575 = vmatprep.mubr.bf16.mxu0 %v2095_v3  ;;  %595 = vmatprep.mubr.bf16.mxu1 %v2095_v3  ;;  %s445_s29 = scalar_select %p444_p12, %s2081_s13, 1  ;;  %vm692_vm1 = vcmask 257024  }
  0x1e   : > { %s447_s17 = scalar_select %p446_p13, %s2254_s21, 31  ;;  %v2300_v20 = vld [vmem:[%s2639_s4] ss:$0 sm:$0xff] }
  0x1f   : > { %v2239_v1 = vld [vmem:[%s2661_s3 + $0x14] ss:$8 sps:$4 sm:$0xff]   ;;  %v2244_v2 = vld [vmem:[%s2661_s3 + $0x10] ss:$8 sps:$4 sm:$0xff]   ;;  %v2249_v4 = vld [vmem:[%s2661_s3 + $0x4] ss:$8 sps:$4 sm:$0xff]  }
  0x20   : > { %555 = vmatprep.subr.bf16.mxu0 %v2239_v1  ;;  %1885 = vmatprep.subr.bf16.mxu1 %v2239_v1  ;;  %v2262_v5 = vld [vmem:[%s2661_s3] ss:$8 sps:$4 sm:$0xff]   ;;  %s2270_s28 = sshll.u32 %s445_s29, 5  ;;  %s1656_s6 = sadd.s32 4294967295, %s1655_s26 }
  0x21   : > { %556 = vmatpush1.bf16.msra.mxu0 %v2244_v2  ;;  %1887 = vmatpush1.bf16.msra.mxu1 %v2244_v2  ;;  %s449_s20 = sadd.s32 %s2270_s28, %s447_s17  ;;  %p455_p0 = scmp.gt.s32.totalorder %s1656_s6, 0 }
  0x22   : > { %557 = vmatprep.subr.bf16.mxu0 %v2249_v4  ;;  %1886 = vmatprep.subr.bf16.mxu1 %v2249_v4  ;;  %s1654_s24 = sshll.u32 %s449_s20, 3  ;;  %s472_s25 = sadd.s32 4, %s1655_s26 }
  0x23   : > { %s451_s15 = scalar_lea.vmem %s2662_s0, %s1654_s24  ;;  %p473_p1 = scmp.lt.s32.totalorder %s472_s25, 15 }
  0x24   : > { %s2695_s6 = smov (!%p455_p0, %s1656_s6), 0  ;;  %v498_v6 = vld [vmem:[%s451_s15] sm:$0xff]  ;;  %v499_v7 = vld [vmem:[%s451_s15 + $0x8] sm:$0xff]  ;;  %v500_v12 = vld [vmem:[%s451_s15 + $0x10] sm:$0xff]  ;;  %s2319_s0 = scalar_lea.vmem [#allocation4], %s2234_s18 }
  0x25   : > { %558 = vmatpush1.bf16.msra.mxu0 %v2262_v5  ;;  %1888 = vmatpush1.bf16.msra.mxu1 %v2262_v5  ;;  %v502_v8 = vld [vmem:[%s451_s15 + $0x20] sm:$0xff]  ;;  %s2697_s25 = smov (!%p473_p1, %s472_s25), 15  ;;  %v506_v9 = vpack.c.bf16 %v499_v7, %v498_v6  ;;  %v503_v10 = vld [vmem:[%s451_s15 + $0x28] sm:$0xff]  ;;  %s1657_s29 = sshll.u32 %s2695_s6, 1  ;;  %v501_v13 = vld [vmem:[%s451_s15 + $0x18] sm:$0xff] }
  0x26   : > { %v508_v11 = vpack.c.bf16 %v503_v10, %v502_v8  ;;  %p460_p2 = scmp.lt.s32.totalorder %s1657_s29, 31  ;;  %s1661_s20 = sshll.u32 %s2697_s25, 1  ;;  %v504_v14 = vld [vmem:[%s451_s15 + $0x30] sm:$0xff]  ;;  %v505_v15 = vld [vmem:[%s451_s15 + $0x38] sm:$0xff]  ;;  %v507_v16 = vpack.c.bf16 %v501_v13, %v500_v12 }
  0x27   : > { %p478_p4 = scmp.lt.s32.totalorder %s1661_s20, 31  ;;  %v509_v17 = vpack.c.bf16 %v505_v15, %v504_v14  ;;  %p1682_p5 = scmp.le.s32.totalorder %s2077_s12, 0 }
  0x28   : > { %1668 = vmatmul.mubr.msk.bf16.vlgmr.msra.gmra.mxu0 %vm530_vm0, %v506_v9  ;;  %1670 = vmatmul.mubr.msk.bf16.vlgmr.msra.gmra.mxu1 %vm530_vm0, %v508_v11  ;;  %s2699_s29 = smov (!%p460_p2, %s1657_s29), 31 }
  0x29   : > { %585 = vmatprep.mubr.bf16.mxu0 %v2095_v3  ;;  %605 = vmatprep.mubr.bf16.mxu1 %v2095_v3  ;;  %s2701_s20 = smov (!%p478_p4, %s1661_s20), 31  ;;  %s463_s3 = sadd.s32 %s2270_s28, %s2699_s29 }
  0x2a   : > { %s1659_s6 = sshll.u32 %s463_s3, 3  ;;  %s481_s19 = sadd.s32 %s2270_s28, %s2701_s20 }
  0x2b   : > { %s2285_s24 = scalar_lea.vmem %s2636_s1, %s1659_s6  ;;  %s1663_s25 = sshll.u32 %s481_s19, 3 }
  0x2c   : > { %s2290_s27 = scalar_lea.vmem %s2637_s2, %s1663_s25 }
  0x30   : > { %1669 = vmatmul.mubr.msk.bf16.gmra.mxu0 %vm530_vm0, %v507_v16  ;;  %1671 = vmatmul.mubr.msk.bf16.gmra.mxu1 %vm530_vm0, %v509_v17 }
  0xe8   : > { %v577_v19 = vpop.f32.mrf.mxu0  ;;  %v597_v22 = vpop.f32.mrf.mxu1 }
  0xe9   : > { %v622_v21 = vadd.f32 %v1672_v18, %v577_v19  ;;  %v626_v23 = vadd.f32 %v1672_v18, %v597_v22 }
  0xea   : > { %v579_v24 = vpop.f32.mrf.mxu0  ;;  %v599_v26 = vpop.f32.mrf.mxu1 }
  0xeb   : > { %630 = vst [vmem:[#allocation3 + $0x30] sm:$0xff] %v622_v21  ;;  %v644_v25 = vadd.f32 %v2300_v20, %v579_v24  ;;  %634 = vst [vmem:[#allocation3 + $0x8] sm:$0xff] %v626_v23  ;;  %v648_v27 = vadd.f32 %v2300_v20, %v599_v26 }
  0xec   : > { %v581_v28 = vpop.f32.mrf.mxu0  ;;  %v601_v31 = vpop.f32.mrf.mxu1 }
  0xed   : > { %v652_v29 = vmax.f32 %v644_v25, 0.0  ;;  %v623_v30 = vadd.f32 %v1672_v18, %v581_v28  ;;  %v656_v32 = vmax.f32 %v648_v27, 0.0  ;;  %v627_v33 = vadd.f32 %v1672_v18, %v601_v31 }
  0xee   : > { %v583_v34 = vpop.f32.mrf.mxu0  ;;  %v603_v37 = vpop.f32.mrf.mxu1 }
  0xef   : > { %v1765_v35 = vpack.c.bf16 %v652_v29, %v652_v29  ;;  %631 = vst [vmem:[#allocation3] sm:$0xff] %v623_v30  ;;  %v645_v36 = vadd.f32 %v2300_v20, %v583_v34  ;;  %v1769_v38 = vpack.c.bf16 %v656_v32, %v656_v32  ;;  %635 = vst [vmem:[#allocation3 + $0x20] sm:$0xff] %v627_v33 }
  0xf0   : > { %v649_v39 = vadd.f32 %v2300_v20, %v603_v37  ;;  %v587_v40 = vpop.f32.mrf.mxu0  ;;  %v607_v43 = vpop.f32.mrf.mxu1 }
  0xf1   : > { %693 = vst.msk [vmem:[#allocation2 + $0x8] sm:$0xf] %vm692_vm1, %v1765_v35  ;;  %v653_v41 = vmax.f32 %v645_v36, 0.0  ;;  %v624_v42 = vadd.f32 %v1672_v18, %v587_v40  ;;  %697 = vst.msk [vmem:[#allocation2 + $0x18] sm:$0xf] %vm692_vm1, %v1769_v38  ;;  %v628_v45 = vadd.f32 %v1672_v18, %v607_v43 }
  0xf2   : > { %v657_v44 = vmax.f32 %v649_v39, 0.0  ;;  %v589_v46 = vpop.f32.mrf.mxu0  ;;  %v609_v49 = vpop.f32.mrf.mxu1 }
  0xf3   : > { %v1766_v47 = vpack.c.bf16 %v653_v41, %v653_v41  ;;  %632 = vst [vmem:[#allocation3 + $0x18] sm:$0xff] %v624_v42  ;;  %v646_v48 = vadd.f32 %v2300_v20, %v589_v46  ;;  %636 = vst [vmem:[#allocation3 + $0x28] sm:$0xff] %v628_v45  ;;  %v650_v51 = vadd.f32 %v2300_v20, %v609_v49 }
  0xf4   : > { %v1770_v50 = vpack.c.bf16 %v657_v44, %v657_v44  ;;  %v591_v52 = vpop.f32.mrf.mxu0  ;;  %v611_v55 = vpop.f32.mrf.mxu1 }
  0xf5   : > { %694 = vst.msk [vmem:[#allocation2 + $0xc] sm:$0xf] %vm692_vm1, %v1766_v47  ;;  %v654_v53 = vmax.f32 %v646_v48, 0.0  ;;  %v625_v54 = vadd.f32 %v1672_v18, %v591_v52  ;;  %v658_v56 = vmax.f32 %v650_v51, 0.0  ;;  %v629_v57 = vadd.f32 %v1672_v18, %v611_v55 }
  0xf6   : > { %698 = vst.msk [vmem:[#allocation2 + $0x1c] sm:$0xf] %vm692_vm1, %v1770_v50  ;;  %v593_v58 = vpop.f32.mrf.mxu0  ;;  %v613_v61 = vpop.f32.mrf.mxu1 }
  0xf7   : > { %v1767_v59 = vpack.c.bf16 %v654_v53, %v654_v53  ;;  %633 = vst [vmem:[#allocation3 + $0x10] sm:$0xff] %v625_v54  ;;  %v647_v60 = vadd.f32 %v2300_v20, %v593_v58  ;;  %v1771_v62 = vpack.c.bf16 %v658_v56, %v658_v56  ;;  %637 = vst [vmem:[#allocation3 + $0x38] sm:$0xff] %v629_v57 }
  0xf8   : > { %v651_v63 = vadd.f32 %v2300_v20, %v613_v61 }
  0xf9   : > { %695 = vst.msk [vmem:[#allocation2 + $0x10] sm:$0xf] %vm692_vm1, %v1767_v59  ;;  %v655_v3 = vmax.f32 %v647_v60, 0.0  ;;  %699 = vst.msk [vmem:[#allocation2 + $0x20] sm:$0xf] %vm692_vm1, %v1771_v62 }
  0xfa   : > { %v659_v6 = vmax.f32 %v651_v63, 0.0  ;;  %704 = sbr.rel (%p1682_p5) target bundleno = 469 (0x1d5), region = 60 }
  0xfb   : > { %v1768_v7 = vpack.c.bf16 %v655_v3, %v655_v3 }
  0xfc   : > { %v1772_v8 = vpack.c.bf16 %v659_v6, %v659_v6 }
  0xfd   : > { %696 = vst.msk [vmem:[#allocation2 + $0x14] sm:$0xf] %vm692_vm1, %v1768_v7 }
  0xfe   : > { %700 = vst.msk [vmem:[#allocation2 + $0x24] sm:$0xf] %vm692_vm1, %v1772_v8 }
  0xff   : > { %723 = vmatprep.subr.bf16.mxu0 %v2239_v1  ;;  %v2096_v9 = vmov 0   ;;  %v705_v10 = vld [vmem:[%s2285_s24] sm:$0xff]  ;;  %v706_v11 = vld [vmem:[%s2285_s24 + $0x8] sm:$0xff] }
 0x100   : > { %724 = vmatpush1.bf16.msra.mxu0 %v2244_v2  ;;  %743 = vmatprep.mubr.bf16.mxu0 %v2096_v9  ;;  %v707_v12 = vpack.c.bf16 %v706_v11, %v705_v10 }
 0x101   : > { %725 = vmatprep.subr.bf16.mxu0 %v2249_v4 }
 0x104   : > { %726 = vmatpush1.bf16.msra.mxu0 %v2262_v5 }
 0x107   : > { %1683 = vmatmul.mubr.msk.bf16.vlgmr.msra.gmra.mxu0 %vm530_vm0, %v707_v12 }
 0x1c7   : > { %v745_v13 = vpop.f32.mrf.mxu0 }
 0x1c9   : > { %v746_v14 = vpop.f32.mrf.mxu0 }
 0x1ca   : > { %v752_v15 = vadd.f32 %v2300_v20, %v746_v14 }
 0x1cb   : > { %v748_v16 = vpop.f32.mrf.mxu0 }
 0x1cc   : > { %v754_v17 = vmax.f32 %v752_v15, 0.0 }
 0x1cd   : > { %v749_v18 = vpop.f32.mrf.mxu0 }
 0x1ce   : > { %v1773_v19 = vpack.c.bf16 %v754_v17, %v754_v17  ;;  %v753_v21 = vadd.f32 %v2300_v20, %v749_v18 }
 0x1d0   : > { %764 = vst.msk [vmem:[#allocation2] sm:$0xf] %vm692_vm1, %v1773_v19  ;;  %v755_v22 = vmax.f32 %v753_v21, 0.0 }
 0x1d2   : > { %v1774_v23 = vpack.c.bf16 %v755_v22, %v755_v22 }
 0x1d4   : > { %765 = vst.msk [vmem:[#allocation2 + $0x4] sm:$0xf] %vm692_vm1, %v1774_v23 }
 0x1d5 PF: > { %p1686_p6 = scmp.ne.s32.totalorder %s2077_s12, 0 }
 0x1d7   : > { %769 = sbr.rel (%p1686_p6) target bundleno = 478 (0x1de), region = 64 }
 0x1dc   : > { %v2097_v24 = vmov 0  }
 0x1dd   : > { %770 = vst.msk [vmem:[#allocation2] sm:$0xf] %vm692_vm1, %v2097_v24  ;;  %771 = vst.msk [vmem:[#allocation2 + $0x4] sm:$0xf] %vm692_vm1, %v2097_v24 }
 0x1de PF: > { %p1687_p7 = scmp.ge.s32.totalorder %s2077_s12, 3 }
 0x1e0   : > { %775 = sbr.rel (%p1687_p7) target bundleno = 699 (0x2bb), region = 68 }
 0x1e5   : > { %794 = vmatprep.subr.bf16.mxu0 %v2239_v1  ;;  %v2098_v25 = vmov 0   ;;  %v776_v26 = vld [vmem:[%s2290_s27] sm:$0xff]  ;;  %v777_v27 = vld [vmem:[%s2290_s27 + $0x8] sm:$0xff] }
 0x1e6   : > { %795 = vmatpush1.bf16.msra.mxu0 %v2244_v2  ;;  %814 = vmatprep.mubr.bf16.mxu0 %v2098_v25  ;;  %v778_v28 = vpack.c.bf16 %v777_v27, %v776_v26 }
 0x1e7   : > { %796 = vmatprep.subr.bf16.mxu0 %v2249_v4 }
 0x1ea   : > { %797 = vmatpush1.bf16.msra.mxu0 %v2262_v5 }
 0x1ed   : > { %1688 = vmatmul.mubr.msk.bf16.vlgmr.msra.gmra.mxu0 %vm530_vm0, %v778_v28 }
 0x2ad   : > { %v816_v29 = vpop.f32.mrf.mxu0 }
 0x2af   : > { %v817_v30 = vpop.f32.mrf.mxu0 }
 0x2b0   : > { %v823_v31 = vadd.f32 %v2300_v20, %v817_v30 }
 0x2b1   : > { %v819_v32 = vpop.f32.mrf.mxu0 }
 0x2b2   : > { %v825_v33 = vmax.f32 %v823_v31, 0.0 }
 0x2b3   : > { %v820_v1 = vpop.f32.mrf.mxu0 }
 0x2b4   : > { %v1775_v34 = vpack.c.bf16 %v825_v33, %v825_v33  ;;  %v824_v2 = vadd.f32 %v2300_v20, %v820_v1 }
 0x2b6   : > { %835 = vst.msk [vmem:[#allocation2 + $0x28] sm:$0xf] %vm692_vm1, %v1775_v34  ;;  %v826_v35 = vmax.f32 %v824_v2, 0.0 }
 0x2b8   : > { %v1776_v36 = vpack.c.bf16 %v826_v35, %v826_v35 }
 0x2ba   : > { %836 = vst.msk [vmem:[#allocation2 + $0x2c] sm:$0xf] %vm692_vm1, %v1776_v36 }
 0x2bb PF: > { %p1691_p9 = scmp.ne.s32.totalorder %s2077_s12, 3 }
 0x2bd   : > { %840 = sbr.rel (%p1691_p9) target bundleno = 708 (0x2c4), region = 72 }
 0x2c2   : > { %v2099_v4 = vmov 0  }
 0x2c3   : > { %841 = vst.msk [vmem:[#allocation2 + $0x28] sm:$0xf] %vm692_vm1, %v2099_v4  ;;  %842 = vst.msk [vmem:[#allocation2 + $0x2c] sm:$0xf] %vm692_vm1, %v2099_v4 }
 0x2c4 PF: > { %v2351_v5 = vld [vmem:[#allocation2 + $0x8] sm:$0xff]   ;;  %v2353_v37 = vld [vmem:[#allocation2 + $0x10] sm:$0xff]   ;;  %s2100_s14 = smov 32   ;;  %s2101_s27 = smov 64   ;;  %v2357_v20 = vld [vmem:[#allocation2 + $0x18] sm:$0xff]   ;;  %vm913_vm2 = vcmask 523264   ;;  %v922_v23 = vlaneseq }
 0x2c5   : > { %880 = vrot.lane.b32.xlu0 %v2351_v5, %s2100_s14  ;;  %893 = vrot.lane.b32.xlu1 %v2353_v37, %s2101_s27  ;;  %v1978_v38 = vld [vmem:[#allocation2 + $0x20] sm:$0xff]   ;;  %v1980_v39 = vld [vmem:[%s2640_s5 + $0x28] sm:$0xff]   ;;  %v1981_v40 = vld [vmem:[%s2640_s5 + $0x58] sm:$0xff]   ;;  %vm1016_vm3 = vcmask 785408   ;;  %s1761_s29 = sshll.u32 %s2081_s13, 5  ;;  %s1522_s20 = sshll.u32 %s2319_s0, 4  ;;  %s2578_s20 = int_to_ptr.vmem [resolvable:$true] %s1522_s20 }
 0x2c6   : > { %1813 = vmatprep.subr.bf16.mxu0 %v1980_v39  ;;  %v1982_v41 = vld [vmem:[%s2640_s5 + $0x20] sm:$0xff]   ;;  %1833 = vmatprep.subr.bf16.mxu1 %v1981_v40  ;;  %v1983_v42 = vld [vmem:[%s2640_s5 + $0x50] sm:$0xff]   ;;  %v1984_v43 = vld [vmem:[%s2640_s5 + $0x18] sm:$0xff]   ;;  %v2447_v26 = vshrl.u32 %v922_v23, 7  ;;  %s1519_s28 = sadd.s32 %s1761_s29, %s2254_s21  ;;  %s2679_s3 = sand.u32 1, %s2069_s10  }
 0x2c7   : > { %1814 = vmatpush3.bf16.msra.mxu0 %v1980_v39  ;;  %1834 = vmatpush3.bf16.msra.mxu1 %v1981_v40  ;;  %v1985_v44 = vld [vmem:[%s2640_s5 + $0x48] sm:$0xff]   ;;  %v1986_v46 = vld [vmem:[%s2640_s5 + $0x10] sm:$0xff]   ;;  %v1987_v47 = vld [vmem:[%s2640_s5 + $0x40] sm:$0xff]   ;;  %s1762_s13 = sshll.u32 %s1519_s28, 7  ;;  %s2584_s6 = scalar_lea.sflag [#allocation5], %s2679_s3 }
 0x2c8   : > { %1815 = vmatprep.subr.bf16.mxu0 %v1982_v41  ;;  %1835 = vmatprep.subr.bf16.mxu1 %v1983_v42  ;;  %v1988_v48 = vld [vmem:[%s2640_s5 + $0x8] sm:$0xff]   ;;  %v1989_v49 = vld [vmem:[%s2640_s5 + $0x38] sm:$0xff]   ;;  %v1991_v50 = vld [vmem:[%s2640_s5] sm:$0xff]   ;;  %v925_v29 = vadd.s32 16, %v2447_v26  ;;  %v927_v32 = vadd.s32 32, %v2447_v26  ;;  %v929_v33 = vadd.s32 48, %v2447_v26  ;;  %s2576_s18 = scalar_lea.hbm %s2644_s9, %s1762_s13 }
 0x2c9   : > { %882 = vrot.lane.b32.xlu0 %v2353_v37, %s2100_s14  ;;  %895 = vrot.lane.b32.xlu1 %v2357_v20, %s2101_s27  ;;  %v1992_v51 = vld [vmem:[%s2640_s5 + $0x30] sm:$0xff]   ;;  %v1993_v52 = vld [vmem:[%s2640_s5 + $0x88] sm:$0xff]   ;;  %v1990_v53 = vld [vmem:[#allocation2] sm:$0xff]   ;;  %v924_v1 = vadd.s32 8, %v2447_v26  ;;  %v931_v2 = vand.u32 15, %v2447_v26  ;;  %v926_v35 = vadd.s32 24, %v2447_v26 }
 0x2ca   : > { %v1979_v45 = vld [vmem:[#allocation2 + $0x28] sm:$0xff]   ;;  %v1994_v61 = vld [vmem:[%s2640_s5 + $0x80] sm:$0xff]   ;;  %v1995_v6 = vld [vmem:[%s2640_s5 + $0x78] sm:$0xff]   ;;  %v933_v34 = vand.u32 15, %v925_v29  ;;  %v930_v36 = vadd.s32 56, %v2447_v26  ;;  %v937_v39 = vand.u32 15, %v929_v33 }
 0x2cb   : > { %1816 = vmatpush3.bf16.msra.mxu0 %v1982_v41  ;;  %1836 = vmatpush3.bf16.msra.mxu1 %v1983_v42  ;;  %v1996_v12 = vld [vmem:[%s2640_s5 + $0x70] sm:$0xff]   ;;  %v1997_v14 = vld [vmem:[%s2640_s5 + $0x68] sm:$0xff]   ;;  %v1998_v15 = vld [vmem:[%s2640_s5 + $0x60] sm:$0xff]   ;;  %vm1098_vm4 = vcmp.lt.s32.totalorder %v2447_v26, 1  ;;  %vm2467_vm6 = vcmp.eq.s32.totalorder %v931_v2, 0  ;;  %vm1338_vm9 = vcmp.lt.s32.totalorder %v2447_v26, 7 }
 0x2cc   : > { %1817 = vmatprep.subr.bf16.mxu0 %v1984_v43  ;;  %1837 = vmatprep.subr.bf16.mxu1 %v1985_v44  ;;  %v1999_v16 = vld [vmem:[%s2642_s7 + $0x8] sm:$0xff]   ;;  %v2000_v17 = vld [vmem:[%s2642_s7] sm:$0xff]   ;;  %vm2463_vm5 = vcmp.eq.s32.totalorder %v933_v34, 0  ;;  %vm2483_vm8 = vcmp.eq.s32.totalorder %v937_v39, 0  ;;  %s2102_s19 = smov [#allocation4]  }
 0x2cd   : > { %884 = vrot.lane.b32.xlu0 %v2357_v20, %s2100_s14  ;;  %886 = vrot.lane.b32.xlu1 %v1978_v38, %s2100_s14  ;;  %s2001_s14 = scalar_lea.vmem %s2578_s20, 1024  ;;  %s2005_s26 = sshll.u32 %s2102_s19, 4  ;;  %s2006_s26 = int_to_ptr.vmem [resolvable:$false] %s2005_s26 }
 0x2ce   : > { %p2002_p10 = scmp.ne.s32.totalorder %s2578_s20, %s2001_s14  ;;  %s2007_s17 = scalar_lea.vmem %s2006_s26, 2048 }
 0x2cf   : > { %1818 = vmatpush3.bf16.msra.mxu0 %v1984_v43  ;;  %1838 = vmatpush3.bf16.msra.mxu1 %v1985_v44  ;;  %v932_v43 = vand.u32 15, %v924_v1  ;;  %p2008_p13 = scmp.lt.s32.totalorder %s2578_s20, %s2006_s26  ;;  %p2009_p0 = scmp.lt.s32.totalorder %s2007_s17, %s2001_s14 }
 0x2d0   : > { %1819 = vmatprep.subr.bf16.mxu0 %v1986_v46  ;;  %1839 = vmatprep.subr.bf16.mxu1 %v1987_v47  ;;  %p2003_p11 = pnand %p2002_p10, %p2206_p3 }
 0x2d1   : > { %897 = vrot.lane.b32.xlu0 %v1978_v38, %s2101_s27  ;;  %899 = vrot.lane.b32.xlu1 %v1979_v45, %s2101_s27  ;;  %v935_v38 = vand.u32 15, %v927_v32  ;;  %vm2492_vm10 = vcmp.eq.s32.totalorder %v932_v43, 15  ;;  %p2010_p1 = por %p2009_p0, %p2008_p13 }
 0x2d2   : > { %p2004_p12 = pneg %p2003_p11 }
 0x2d3   : > { %1820 = vmatpush3.bf16.msra.mxu0 %v1986_v46  ;;  %1840 = vmatpush3.bf16.msra.mxu1 %v1987_v47  ;;  %v934_v46 = vand.u32 15, %v926_v35  ;;  %v938_v47 = vand.u32 15, %v930_v36  ;;  %vm2479_vm7 = vcmp.eq.s32.totalorder %v935_v38, 0 }
 0x2d4   : > { %1821 = vmatprep.subr.bf16.mxu0 %v1988_v48  ;;  %1841 = vmatprep.subr.bf16.mxu1 %v1989_v49  ;;  %p2011_p2 = pnand %p2010_p1, %p2004_p12 }
 0x2d5   : > { %vm2502_vm11 = vcmp.eq.s32.totalorder %v934_v46, 15  ;;  %vm2506_vm12 = vcmp.eq.s32.totalorder %v938_v47, 15 }
 0x2d7   : > { %1822 = vmatpush3.bf16.msra.mxu0 %v1988_v48  ;;  %1842 = vmatpush3.bf16.msra.mxu1 %v1989_v49 }
 0x2d8   : > { %1823 = vmatprep.subr.bf16.mxu0 %v1991_v50  ;;  %1843 = vmatprep.subr.bf16.mxu1 %v1992_v51 }
 0x2db   : > { %1824 = vmatpush3.bf16.msra.mxu0 %v1991_v50  ;;  %1844 = vmatpush3.bf16.msra.mxu1 %v1992_v51 }
 0x2dc   : > { %1853 = vmatprep.subr.bf16.mxu0 %v1993_v52  ;;  %1873 = vmatprep.subr.bf16.mxu1 %v1999_v16 }
 0x337   : > { %v881_v54 = vpop.permute.xlu0 %880  ;;  %v894_v56 = vpop.permute.xlu1 %893 }
 0x338   : > { %v903_v55 = vsel %vm530_vm0, %v1990_v53, %v881_v54 }
 0x339   : > { %v915_v57 = vsel %vm913_vm2, %v903_v55, %v894_v56 }
 0x33a   : > { %1825 = vmatprep.mubr.msk.bf16.mxu0 %vm1016_vm3, %v915_v57  ;;  %1845 = vmatprep.mubr.msk.bf16.mxu1 %vm1016_vm3, %v915_v57 }
 0x33b   : > { %v883_v58 = vpop.permute.xlu0 %882  ;;  %v896_v60 = vpop.permute.xlu1 %895 }
 0x33c   : > { %v906_v59 = vsel %vm530_vm0, %v2351_v5, %v883_v58 }
 0x33d   : > { %v917_v62 = vsel %vm913_vm2, %v906_v59, %v896_v60 }
 0x33e   : > { %1826 = vmatmul.mubr.msk.bf16.vlgmr.msra.gmra.mxu0 %vm1016_vm3, %v917_v62  ;;  %1846 = vmatmul.mubr.msk.bf16.vlgmr.msra.gmra.mxu1 %vm1016_vm3, %v917_v62 }
 0x33f   : > { %1854 = vmatpush3.bf16.msra.mxu0 %v1993_v52  ;;  %v885_v63 = vpop.permute.xlu0 %884  ;;  %v887_v3 = vpop.permute.xlu1 %886  ;;  %1874 = vmatpush3.bf16.msra.mxu1 %v1999_v16  ;;  %v928_v52 = vadd.s32 40, %v2447_v26 }
 0x340   : > { %1855 = vmatprep.subr.bf16.mxu0 %v1994_v61  ;;  %v909_v7 = vsel %vm530_vm0, %v2353_v37, %v885_v63  ;;  %v912_v8 = vsel %vm530_vm0, %v2357_v20, %v887_v3  ;;  %1875 = vmatprep.subr.bf16.mxu1 %v2000_v17 }
 0x343   : > { %1856 = vmatpush3.bf16.msra.mxu0 %v1994_v61  ;;  %v898_v9 = vpop.permute.xlu0 %897  ;;  %v900_v11 = vpop.permute.xlu1 %899  ;;  %1876 = vmatpush3.bf16.msra.mxu1 %v2000_v17 }
 0x344   : > { %v919_v10 = vsel %vm913_vm2, %v909_v7, %v898_v9  ;;  %1857 = vmatprep.subr.bf16.mxu0 %v1995_v6  ;;  %v921_v13 = vsel %vm913_vm2, %v912_v8, %v900_v11  ;;  %v936_v11 = vand.u32 15, %v928_v52 }
 0x345   : > { %1829 = vmatprep.mubr.msk.bf16.mxu0 %vm1016_vm3, %v919_v10  ;;  %1849 = vmatprep.mubr.msk.bf16.mxu1 %vm1016_vm3, %v919_v10 }
 0x346   : > { %1830 = vmatmul.mubr.msk.bf16.gmra.mxu0 %vm1016_vm3, %v921_v13  ;;  %1850 = vmatmul.mubr.msk.bf16.gmra.mxu1 %vm1016_vm3, %v921_v13  ;;  %vm2527_vm13 = vcmp.eq.s32.totalorder %v936_v11, 15 }
 0x347   : > { %1858 = vmatpush3.bf16.msra.mxu0 %v1995_v6  ;;  %1865 = vmatprep.mubr.msk.bf16.mxu0 %vm1016_vm3, %v915_v57 }
 0x348   : > { %1859 = vmatprep.subr.bf16.mxu0 %v1996_v12 }
 0x34b   : > { %1860 = vmatpush3.bf16.msra.mxu0 %v1996_v12 }
 0x34c   : > { %1861 = vmatprep.subr.bf16.mxu0 %v1997_v14 }
 0x34f   : > { %1862 = vmatpush3.bf16.msra.mxu0 %v1997_v14 }
 0x350   : > { %1863 = vmatprep.subr.bf16.mxu0 %v1998_v15 }
 0x353   : > { %1864 = vmatpush3.bf16.msra.mxu0 %v1998_v15 }
 0x356   : > { %1866 = vmatmul.mubr.msk.bf16.vlgmr.msra.gmra.mxu0 %vm1016_vm3, %v917_v62 }
 0x357   : > { %1869 = vmatprep.mubr.msk.bf16.mxu0 %vm1016_vm3, %v919_v10 }
 0x35e   : > { %1870 = vmatmul.mubr.msk.bf16.gmra.mxu0 %vm1016_vm3, %v921_v13 }
 0x3fe   : > { %v1827_v18 = vpop.f32.mrf.mxu0  ;;  %v1847_v25 = vpop.f32.mrf.mxu1 }
 0x3ff   : > { %v1092_v40 = vrot.slane %v1827_v18, 7 }
 0x400   : > { %v1059_v19 = vpop.f32.mrf.mxu0  ;;  %v1185_v28 = vpop.f32.mrf.mxu1 }
 0x401   : > { %v1090_v41 = vrot.slane %v1059_v19, 7 }
 0x402   : > { %v1828_v21 = vpop.f32.mrf.mxu0  ;;  %v2452_v31 = vpop.f32.mrf.mxu1 }
 0x403   : > { %v1093_v53 = vrot.slane %v1828_v21, 7 }
 0x404   : > { %v1062_v22 = vpop.f32.mrf.mxu0  ;;  %v1188_v20 = vpop.f32.mrf.mxu1 }
 0x405   : > { %v1091_v4 = vrot.slane %v1062_v22, 7  ;;  %v1103_v12 = vsel %vm1098_vm4, %v1092_v40, %v1093_v53 }
 0x406   : > { %v2445_v24 = vpop.f32.mrf.mxu0  ;;  %v1851_v54 = vpop.f32.mrf.mxu1  ;;  %v1197_v1 = vadd.f32 %v2452_v31, %v1103_v12 }
 0x407   : > { %v1104_v48 = vsel %vm1098_vm4, %v1091_v4, %v1092_v40  ;;  %v1105_v57 = vsel %vm1098_vm4, %v1090_v41, %v1091_v4  ;;  %v1096_v58 = vrot.slane %v2445_v24, 7 }
 0x408   : > { %v2449_v27 = vpop.f32.mrf.mxu0  ;;  %v1109_v62 = vsel %vm2463_vm5, 0.0, %v1104_v48  ;;  %v1201_v13 = vpop.f32.mrf.mxu1  ;;  %v1189_v18 = vadd.f32 %v1188_v20, %v1105_v57 }
 0x409   : > { %v1094_v49 = vrot.slane %v2449_v27, 7  ;;  %v1194_v17 = vadd.f32 %v1847_v25, %v1109_v62 }
 0x40a   : > { %v1832_v30 = vpop.f32.mrf.mxu0  ;;  %v1852_v34 = vpop.f32.mrf.mxu1 }
 0x40b   : > { %v1097_v5 = vrot.slane %v1832_v30, 7  ;;  %v1102_v7 = vsel %vm1098_vm4, %v1093_v53, %v1094_v49 }
 0x40c   : > { %v2460_v37 = vpop.f32.mrf.mxu0  ;;  %v1111_v23 = vsel %vm2479_vm7, 0.0, %v1102_v7  ;;  %v1204_v47 = vpop.f32.mrf.mxu1 }
 0x40d   : > { %v1106_v50 = vsel %vm1098_vm4, %v1097_v5, %v1090_v41  ;;  %v1095_v59 = vrot.slane %v2460_v37, 7  ;;  %v1099_v24 = vsel %vm1098_vm4, %v1096_v58, %v1097_v5  ;;  %v1202_v4 = vadd.f32 %v1201_v13, %v1111_v23 }
 0x40e   : > { %v1107_v63 = vsel %vm2467_vm6, 0.0, %v1106_v50  ;;  %v1213_v5 = vadd.f32 %v1852_v34, %v1099_v24 }
 0x40f   : > { %v1186_v19 = vadd.f32 %v1185_v28, %v1107_v63  ;;  %v1100_v21 = vsel %vm1098_vm4, %v1095_v59, %v1096_v58  ;;  %v1101_v37 = vsel %vm1098_vm4, %v1094_v49, %v1095_v59 }
 0x410   : > { %v1113_v2 = vsel %vm2483_vm8, 0.0, %v1100_v21  ;;  %v1205_v52 = vadd.f32 %v1204_v47, %v1101_v37 }
 0x416   : > { %v1867_v42 = vpop.f32.mrf.mxu0 }
 0x417   : > { %v1332_v3 = vrot.slane %v1867_v42, 1  ;;  %v1210_v42 = vadd.f32 %v1851_v54, %v1113_v2  ;;  %v1397_v2 = vld [vmem:[#allocation3 + $0x8] sm:$0xff] }
 0x418   : > { %v2476_v51 = vpop.f32.mrf.mxu0 }
 0x419   : > { %v1330_v14 = vrot.slane %v2476_v51, 1 }
 0x41a   : > { %v1868_v60 = vpop.f32.mrf.mxu0 }
 0x41b   : > { %v1333_v6 = vrot.slane %v1868_v60, 1 }
 0x41c   : > { %v1302_v8 = vpop.f32.mrf.mxu0 }
 0x41d   : > { %v1343_v15 = vsel %vm1338_vm9, %v1332_v3, %v1333_v6  ;;  %v1331_v16 = vrot.slane %v1302_v8, 1 }
 0x41e   : > { %v1871_v22 = vpop.f32.mrf.mxu0  ;;  %v1357_v30 = vadd.f32 %v1343_v15, %v1194_v17  ;;  %v1395_v17 = vld [vmem:[#allocation3 + $0x18] sm:$0xff] }
 0x41f   : > { %v1344_v27 = vsel %vm1338_vm9, %v1331_v16, %v1332_v3  ;;  %v1345_v29 = vsel %vm1338_vm9, %v1330_v14, %v1331_v16  ;;  %v1336_v39 = vrot.slane %v1871_v22, 1  ;;  %v1396_v22 = vld [vmem:[#allocation3 + $0x10] sm:$0xff] }
 0x420   : > { %v1348_v25 = vsel %vm2492_vm10, 0.0, %v1344_v27  ;;  %v1355_v28 = vadd.f32 %v1345_v29, %v1186_v19  ;;  %v1315_v32 = vpop.f32.mrf.mxu0  ;;  %v1371_v43 = vadd.f32 %v2230_v0, %v1357_v30  ;;  %v1393_v19 = vld [vmem:[#allocation3 + $0x30] sm:$0xff]  ;;  %v1394_v29 = vld [vmem:[#allocation3] sm:$0xff] }
 0x421   : > { %v1334_v35 = vrot.slane %v1315_v32, 1  ;;  %v1356_v36 = vadd.f32 %v1348_v25, %v1189_v18  ;;  %v1399_v32 = vld [vmem:[#allocation3 + $0x28] sm:$0xff] }
 0x422   : > { %v1872_v20 = vpop.f32.mrf.mxu0  ;;  %v1369_v38 = vadd.f32 %v2230_v0, %v1355_v28  ;;  %v1379_v63 = vmax.f32 %v1371_v43, 0.0 }
 0x423   : > { %v1342_v40 = vsel %vm1338_vm9, %v1333_v6, %v1334_v35  ;;  %v1337_v41 = vrot.slane %v1872_v20, 1  ;;  %v1370_v31 = vadd.f32 %v2230_v0, %v1356_v36 }
 0x424   : > { %v1350_v44 = vsel %vm2502_vm11, 0.0, %v1342_v40  ;;  %v1318_v45 = vpop.f32.mrf.mxu0  ;;  %v1377_v46 = vmax.f32 %v1369_v38, 0.0 }
 0x425   : > { %v1358_v48 = vadd.f32 %v1350_v44, %v1197_v1  ;;  %v1339_v49 = vsel %vm1338_vm9, %v1336_v39, %v1337_v41  ;;  %v1346_v50 = vsel %vm1338_vm9, %v1337_v41, %v1330_v14  ;;  %v1335_v51 = vrot.slane %v1318_v45, 1 }
 0x426   : > { %v1354_v53 = vsel %vm2506_vm12, 0.0, %v1346_v50  ;;  %v1361_v54 = vadd.f32 %v1339_v49, %v1210_v42  ;;  %v1378_v55 = vmax.f32 %v1370_v31, 0.0 }
 0x427   : > { %v1372_v56 = vadd.f32 %v2230_v0, %v1358_v48  ;;  %v1340_v57 = vsel %vm1338_vm9, %v1335_v51, %v1336_v39  ;;  %v1341_v58 = vsel %vm1338_vm9, %v1334_v35, %v1335_v51  ;;  %v1362_v59 = vadd.f32 %v1354_v53, %v1213_v5  ;;  %v1400_v5 = vld [vmem:[#allocation3 + $0x38] sm:$0xff]  ;;  %v1398_v39 = vld [vmem:[#allocation3 + $0x20] sm:$0xff] }
 0x428   : > { %v1352_v60 = vsel %vm2527_vm13, 0.0, %v1340_v57  ;;  %v1359_v61 = vadd.f32 %v1341_v58, %v1202_v4  ;;  %v1385_v62 = vpack.c.bf16 %v1378_v55, %v1377_v46  ;;  %v1375_v10 = vadd.f32 %v2230_v0, %v1361_v54 }
 0x429   : > { %v1380_v3 = vmax.f32 %v1372_v56, 0.0  ;;  %v1360_v6 = vadd.f32 %v1352_v60, %v1205_v52  ;;  %v1376_v26 = vadd.f32 %v2230_v0, %v1362_v59 }
 0x42a   : > { %v1373_v7 = vadd.f32 %v2230_v0, %v1359_v61  ;;  %1877 = vmatprep.mubr.msk.bf16.mxu1 %vm530_vm0, %v1385_v62  ;;  %v1383_v14 = vmax.f32 %v1375_v10, 0.0 }
 0x42b   : > { %v1386_v8 = vpack.c.bf16 %v1380_v3, %v1379_v63  ;;  %v1374_v9 = vadd.f32 %v2230_v0, %v1360_v6  ;;  %v1384_v15 = vmax.f32 %v1376_v26, 0.0 }
 0x42c   : > { %v1381_v11 = vmax.f32 %v1373_v7, 0.0 }
 0x42d   : > { %1878 = vmatmul.mubr.msk.bf16.vlgmr.msra.gmra.mxu1 %vm530_vm0, %v1386_v8  ;;  %v1382_v12 = vmax.f32 %v1374_v9, 0.0  ;;  %v1388_v16 = vpack.c.bf16 %v1384_v15, %v1383_v14 }
 0x42f   : > { %v1387_v13 = vpack.c.bf16 %v1382_v12, %v1381_v11 }
 0x431   : > { %1881 = vmatprep.mubr.msk.bf16.mxu1 %vm530_vm0, %v1387_v13 }
 0x435   : > { %1882 = vmatmul.mubr.msk.bf16.gmra.mxu1 %vm530_vm0, %v1388_v16 }
 0x4ed   : > { %v1879_v18 = vpop.f32.mrf.mxu1 }
 0x4ee   : > { %v1468_v21 = vadd.f32 %v1879_v18, %v1395_v17 }
 0x4ef   : > { %v1459_v0 = vpop.f32.mrf.mxu1 }
 0x4f0   : > { %v1492_v23 = vmax.f32 %v1468_v21, 0.0  ;;  %v1460_v24 = vadd.f32 %v1459_v0, %v1393_v19 }
 0x4f1   : > { %v1880_v27 = vpop.f32.mrf.mxu1 }
 0x4f2   : > { %1500 = vst [vmem:[%s2319_s0 + $0x10] sm:$0xff] %v1492_v23  ;;  %v1490_v30 = vmax.f32 %v1460_v24, 0.0  ;;  %v1471_v25 = vadd.f32 %v1880_v27, %v1396_v22 }
 0x4f3   : > { %v1462_v28 = vpop.f32.mrf.mxu1 }
 0x4f4   : > { %1498 = vst [vmem:[%s2319_s0] sm:$0xff] %v1490_v30  ;;  %v1493_v33 = vmax.f32 %v1471_v25, 0.0  ;;  %v1463_v1 = vadd.f32 %v1462_v28, %v1394_v29 }
 0x4f5   : > { %v1883_v34 = vpop.f32.mrf.mxu1 }
 0x4f6   : > { %1501 = vst [vmem:[%s2319_s0 + $0x18] sm:$0xff] %v1493_v33  ;;  %v1491_v35 = vmax.f32 %v1463_v1, 0.0  ;;  %v1484_v36 = vadd.f32 %v1883_v34, %v1399_v32 }
 0x4f7   : > { %v1475_v4 = vpop.f32.mrf.mxu1 }
 0x4f8   : > { %1499 = vst [vmem:[%s2319_s0 + $0x8] sm:$0xff] %v1491_v35  ;;  %v1496_v37 = vmax.f32 %v1484_v36, 0.0  ;;  %v1476_v20 = vadd.f32 %v1475_v4, %v1397_v2 }
 0x4f9   : > { %v1884_v38 = vpop.f32.mrf.mxu1 }
 0x4fa   : > { %1504 = vst [vmem:[%s2319_s0 + $0x30] sm:$0xff] %v1496_v37  ;;  %v1494_v40 = vmax.f32 %v1476_v20, 0.0  ;;  %v1487_v41 = vadd.f32 %v1884_v38, %v1400_v5 }
 0x4fb   : > { %v1478_v31 = vpop.f32.mrf.mxu1 }
 0x4fc   : > { %1502 = vst [vmem:[%s2319_s0 + $0x20] sm:$0xff] %v1494_v40  ;;  %v1497_v42 = vmax.f32 %v1487_v41, 0.0  ;;  %v1479_v43 = vadd.f32 %v1478_v31, %v1398_v39 }
 0x4fe   : > { %1505 = vst [vmem:[%s2319_s0 + $0x38] sm:$0xff] %v1497_v42  ;;  %v1495_v44 = vmax.f32 %v1479_v43, 0.0 }
 0x500   : > { %1503 = vst [vmem:[%s2319_s0 + $0x28] sm:$0xff] %v1495_v44 }
 0x501   : > { %2014 = shalt.err (!%p2011_p2)
}
 0x502   : > { %s2015_s0 = scalar_lea.hbm %s2576_s18, 1024  ;;  %s2019_s25 = scalar_lea.hbm %s2644_s9, 8192 }
 0x503   : > { %p2016_p4 = scmp.ne.s32.totalorder %s2576_s18, %s2015_s0  ;;  %p2020_p7 = scmp.lt.s32.totalorder %s2576_s18, %s2644_s9 }
 0x504   : > { %p2021_p9 = scmp.lt.s32.totalorder %s2019_s25, %s2015_s0 }
 0x505   : > { %p2017_p5 = pnand %p2016_p4, %p2206_p3 }
 0x506   : > { %p2022_p10 = por %p2021_p9, %p2020_p7 }
 0x507   : > { %p2018_p6 = pneg %p2017_p5 }
 0x509   : > { %p2023_p11 = pnand %p2022_p10, %p2018_p6 }
 0x50b   : > { %2026 = shalt.err (!%p2023_p11)
}
 0x50c   : > { %s2103_s28 = smov 128   ;;  %s2104_s13 = smov 8  }
 0x50d   : > { %1889 = dma.vmem_to_hbm [thread:$0]  (%p2206_p3), %s2578_s20, 1024, %s2576_s18, %s2584_s6, %s2103_s28, %s2103_s28, %s2104_s13  }
 0x50e PF: > { %p1895_p12 = scmp.ge.s32.totalorder %s2093_s16, 2  ;;  %s1537_s12 = sand.u32 1, %s2065_s30  }
 0x50f   : > { %s1538_s21 = scalar_lea.sflag [#allocation5], %s1537_s12 }
 0x510   : > { %p1892_p13 = pnand %p1895_p12, %p2215_p8 }
 0x512   : > { %p1893_p0 = pneg %p1892_p13 }
 0x514   : > { %2060 = dma.done.wait (%p1893_p0), %s1538_s21, 1024  }
 0x515   : > { %2062 = vsyncadd (%p1893_p0), %s1538_s21, 4294966272  ;;  %s22_s16 = sadd.s32 1, %s2093_s16   ;;  %s2680_s3 = sld [smem:[#allocation11_spill]] }
 0x516   : > { %p19_p1 = scmp.ge.s32.totalorder %s22_s16, 10   ;;  %s2681_s12 = sld [smem:[#allocation7_spill]] }
 0x517   : > { %s2682_s13 = sld [smem:[#allocation8_spill]]  ;;  %s2685_s30 = smov %s2069_s10 }
 0x518   : > { %s2683_s14 = sld [smem:[#allocation9_spill]]  ;;  %s2686_s10 = smov %s2073_s11 }
 0x519   : > { %s2684_s15 = sld [smem:[#allocation10_spill]]  ;;  %21 = sbr.rel (!%p19_p1) target bundleno = 9 (0x9), region = 115 }
 0x51b   : > { %s2687_s11 = smov %s2680_s3 }
 0x51e   :  { %1543 = vsyncpa [#allocation5], 1 }
 0x51f   :  { %1545 = vsyncpa [#allocation5 + $0x1], 1 }

</bundles_post_ra>
